<compile_context>
chip_gen: v5e
topology: v5e:2x2
jax: 0.10.0
libtpu: 0.0.40
codegen_flags: <defaults>
</compile_context>

<pallas_src>
from functools import partial

import jax
import jax.numpy as jnp
from jax import lax
from jax.experimental import pallas as pl
from jax.experimental.pallas import tpu as pltpu


def _weibull_kernel(x_ref, w1_ref, b1_ref, w2t_ref, b2_ref, o_ref, *,
                    use_reduction):
    """One batch tile. x_ref: (TB, in_dim); o_ref: (out_dim, TB)."""
    slope = jnp.float32(0.01)  # F.leaky_relu default negative_slope

    # Fused first layer (both branches), contracting over in_dim:
    #   (2H, in) . (TB, in) -> (2H, TB)   (batch stays on the 128-lane axis)
    h = lax.dot_general(
        w1_ref[...], x_ref[...],
        dimension_numbers=(((1,), (1,)), ((), ())),
        preferred_element_type=jnp.float32) + b1_ref[...]
    h = jnp.maximum(h, slope * h)  # leaky_relu (valid since 0 < slope < 1)

    if use_reduction:
        # out_dim == 1: weighted sublane reduction on VPU/XLU instead of a
        # heavily padded second MXU pass.  (2H,1)*(2H,TB) -> sum over 2H.
        logits = jnp.sum(w2t_ref[...] * h, axis=0, keepdims=True) + b2_ref[...]
    else:
        # General out_dim: (2H, out) . (2H, TB) -> (out, TB)
        logits = lax.dot_general(
            w2t_ref[...], h,
            dimension_numbers=(((0,), (0,)), ((), ())),
            preferred_element_type=jnp.float32) + b2_ref[...]

    # exp(rate_logits) * exp(k_logits) == exp(rate_logits + k_logits).
    o_ref[...] = jnp.exp(logits)


@partial(jax.jit, static_argnames=("block_batch",))
def weibull_forward(x, params, *, block_batch=16384):
    """x: (B, in_dim) f32.  params (PyTorch nn.Linear layout):
    (W1r (H,in), b1r (H,), W2r (out,H), b2r (out,),
     W1k (H,in), b1k (H,), W2k (out,H), b2k (out,))."""
    w1r, b1r, w2r, b2r, w1k, b1k, w2k, b2k = params
    B, in_dim = x.shape
    hidden = w1r.shape[0]
    out_dim = w2r.shape[0]
    two_h = 2 * hidden

    # ---- branch fusion: cheap XLA-side packing (folded/reused under jit) ----
    w1 = jnp.concatenate([w1r, w1k], axis=0)                      # (2H, in)
    b1 = jnp.concatenate([b1r, b1k], axis=0).reshape(two_h, 1)    # (2H, 1)
    w2t = jnp.concatenate([w2r, w2k], axis=1).T                   # (2H, out)
    b2 = (b2r + b2k).reshape(out_dim, 1)                          # (out, 1)

    # ---- batch tile: multiple of 128 (output lane axis); single full block
    #      for small B (block == full dim satisfies the (8,128) rule). ----
    if B <= block_batch:
        tb = B
    else:
        tb = max(128, (block_batch // 128) * 128)
    num_tiles = pl.cdiv(B, tb)   # ragged last block handled by Pallas (no pad)

    flops = 2 * B * in_dim * two_h + 2 * B * two_h * out_dim
    bytes_accessed = 4 * (B * in_dim + B * out_dim
                          + two_h * (in_dim + 1 + out_dim) + out_dim)

    out_t = pl.pallas_call(
        partial(_weibull_kernel, use_reduction=(out_dim == 1)),
        out_shape=jax.ShapeDtypeStruct((out_dim, B), jnp.float32),
        grid=(num_tiles,),
        in_specs=[
            pl.BlockSpec((tb, in_dim), lambda i: (i, 0)),         # x tile
            pl.BlockSpec((two_h, in_dim), lambda i: (0, 0)),      # fused W1
            pl.BlockSpec((two_h, 1), lambda i: (0, 0)),           # fused b1
            pl.BlockSpec((two_h, out_dim), lambda i: (0, 0)),     # fused W2^T
            pl.BlockSpec((out_dim, 1), lambda i: (0, 0)),         # fused b2
        ],
        out_specs=pl.BlockSpec((out_dim, tb), lambda i: (0, i)),  # lane-dense
        compiler_params=pltpu.CompilerParams(
            dimension_semantics=("parallel",)),                   # v7x: 2 TCs
        cost_estimate=pl.CostEstimate(flops=flops,
                                      transcendentals=B * out_dim,
                                      bytes_accessed=bytes_accessed),
    )(x, w1, b1, w2t, b2)

    return out_t.T                                                # (B, out_dim)


if __name__ == "__main__":
    # Module defaults: hidden_layers=[10], output_dim=1; pick input_dim=32.
    # batch=300 with block_batch=128 exercises a 3-step grid including a
    # ragged (partial) last block with masked stores.
    batch, input_dim, hidden, output_dim = 300, 32, 10, 1

    key = jax.random.PRNGKey(0)
    kx, k1r, k2r, k1k, k2k = jax.random.split(key, 5)

    x = jax.random.normal(kx, (batch, input_dim), jnp.float32)

    def init_linear(k, fan_in, fan_out):
        """nn.Linear-style init: U(-1/sqrt(fan_in), 1/sqrt(fan_in)); W is (out, in)."""
        kw, kb = jax.random.split(k)
        bound = 1.0 / (fan_in ** 0.5)
        w = jax.random.uniform(kw, (fan_out, fan_in), jnp.float32, -bound, bound)
        b = jax.random.uniform(kb, (fan_out,), jnp.float32, -bound, bound)
        return w, b

    w1r, b1r = init_linear(k1r, input_dim, hidden)
    w2r, b2r = init_linear(k2r, hidden, output_dim)
    w1k, b1k = init_linear(k1k, input_dim, hidden)
    w2k, b2k = init_linear(k2k, hidden, output_dim)
    params = (w1r, b1r, w2r, b2r, w1k, b1k, w2k, b2k)

    out = weibull_forward(x, params, block_batch=128)
    out = jax.block_until_ready(out)

    # Pure-JAX reference with the original (unfused) parameters.
    def leaky(v):
        return jnp.where(v > 0, v, 0.01 * v)

    rate_logits = leaky(x @ w1r.T + b1r) @ w2r.T + b2r
    k_logits = leaky(x @ w1k.T + b1k) @ w2k.T + b2k
    ref = jnp.exp(rate_logits) * jnp.exp(k_logits)

    assert out.shape == (batch, output_dim), out.shape
    assert jnp.allclose(out, ref, rtol=1e-5, atol=1e-5), (out, ref)

    print("KERNEL_OK")
</pallas_src>

<mosaic_0001>
module attributes {stable_mosaic.version = 11 : i64} {
  func.func @_weibull_kernel(%arg0: i32, %arg1: memref<128x32xf32, #tpu.memory_space<vmem>>, %arg2: memref<20x32xf32, #tpu.memory_space<vmem>>, %arg3: memref<20x1xf32, #tpu.memory_space<vmem>>, %arg4: memref<20x1xf32, #tpu.memory_space<vmem>>, %arg5: memref<1x1xf32, #tpu.memory_space<vmem>>, %arg6: memref<1x128xf32, #tpu.memory_space<vmem>>) attributes {dimension_semantics = [#tpu.dimension_semantics<parallel>], iteration_bounds = array<i64: 3>, scalar_prefetch = 0 : i64, scratch_operands = 0 : i64, tpu.core_type = #tpu.core_type<tc>, window_params = [{transform_indices = @transform_0, window_bounds = array<i64: 128, 32>}, {pipeline_mode = #tpu.pipeline_mode<synchronous>, transform_indices = @transform_1, window_bounds = array<i64: 20, 32>}, {pipeline_mode = #tpu.pipeline_mode<synchronous>, transform_indices = @transform_2, window_bounds = array<i64: 20, 1>}, {pipeline_mode = #tpu.pipeline_mode<synchronous>, transform_indices = @transform_3, window_bounds = array<i64: 20, 1>}, {pipeline_mode = #tpu.pipeline_mode<synchronous>, transform_indices = @transform_4, window_bounds = array<i64: 1, 1>}, {transform_indices = @transform_5, window_bounds = array<i64: 1, 128>}]} {
    %c0 = arith.constant 0 : index
    %c0_0 = arith.constant 0 : index
    %0 = vector.load %arg2[%c0, %c0_0] : memref<20x32xf32, #tpu.memory_space<vmem>>, vector<20x32xf32>
    %c0_1 = arith.constant 0 : index
    %c0_2 = arith.constant 0 : index
    %1 = vector.load %arg1[%c0_1, %c0_2] : memref<128x32xf32, #tpu.memory_space<vmem>>, vector<128x32xf32>
    %cst = arith.constant dense<0.000000e+00> : vector<20x128xf32>
    %2 = tpu.matmul %0, %1, %cst {dimension_numbers = #tpu.dot_dimension_numbers<[1], [1], [0], [0], [0, 0, 1, 0], [], []>} : vector<20x32xf32>, vector<128x32xf32>, vector<20x128xf32> -> vector<20x128xf32>
    %c0_3 = arith.constant 0 : index
    %c0_4 = arith.constant 0 : index
    %3 = vector.load %arg3[%c0_3, %c0_4] : memref<20x1xf32, #tpu.memory_space<vmem>>, vector<20x1xf32>
    %4 = vector.broadcast %3 : vector<20x1xf32> to vector<20x128xf32>
    %5 = arith.addf %2, %4 : vector<20x128xf32>
    %cst_5 = arith.constant 0.00999999977 : f32
    %6 = vector.broadcast %cst_5 : f32 to vector<20x128xf32>
    %7 = arith.mulf %6, %5 : vector<20x128xf32>
    %8 = arith.maximumf %5, %7 : vector<20x128xf32>
    %c0_6 = arith.constant 0 : index
    %c0_7 = arith.constant 0 : index
    %9 = vector.load %arg4[%c0_6, %c0_7] : memref<20x1xf32, #tpu.memory_space<vmem>>, vector<20x1xf32>
    %10 = vector.broadcast %9 : vector<20x1xf32> to vector<20x128xf32>
    %11 = arith.mulf %10, %8 : vector<20x128xf32>
    %cst_8 = arith.constant dense<0.000000e+00> : vector<128xf32>
    %12 = vector.multi_reduction <add>, %11, %cst_8 [0] : vector<20x128xf32> to vector<128xf32>
    %13 = vector.shape_cast %12 : vector<128xf32> to vector<1x128xf32>
    %c0_9 = arith.constant 0 : index
    %c0_10 = arith.constant 0 : index
    %14 = vector.load %arg5[%c0_9, %c0_10] : memref<1x1xf32, #tpu.memory_space<vmem>>, vector<1x1xf32>
    %15 = vector.broadcast %14 : vector<1x1xf32> to vector<1x128xf32>
    %16 = arith.addf %13, %15 : vector<1x128xf32>
    %17 = math.exp %16 : vector<1x128xf32>
    %c0_11 = arith.constant 0 : index
    %c0_12 = arith.constant 0 : index
    %18 = vector.load %arg6[%c0_11, %c0_12] : memref<1x128xf32, #tpu.memory_space<vmem>>, vector<1x128xf32>
    tpu.vector_store %arg6[%c0_11, %c0_12], %17 {strides = array<i32>} : memref<1x128xf32, #tpu.memory_space<vmem>>, vector<1x128xf32>,
    return
  }
  func.func @transform_0(%arg0: i32) -> (i32, i32) {
    %c0_i32 = arith.constant 0 : i32
    %c0_i32_0 = arith.constant 0 : i32
    return %arg0, %c0_i32 : i32, i32
  }
  func.func @transform_1(%arg0: i32) -> (i32, i32) {
    %c0_i32 = arith.constant 0 : i32
    %c0_i32_0 = arith.constant 0 : i32
    %c0_i32_1 = arith.constant 0 : i32
    return %c0_i32, %c0_i32_0 : i32, i32
  }
  func.func @transform_2(%arg0: i32) -> (i32, i32) {
    %c0_i32 = arith.constant 0 : i32
    %c0_i32_0 = arith.constant 0 : i32
    %c0_i32_1 = arith.constant 0 : i32
    return %c0_i32, %c0_i32_0 : i32, i32
  }
  func.func @transform_3(%arg0: i32) -> (i32, i32) {
    %c0_i32 = arith.constant 0 : i32
    %c0_i32_0 = arith.constant 0 : i32
    %c0_i32_1 = arith.constant 0 : i32
    return %c0_i32, %c0_i32_0 : i32, i32
  }
  func.func @transform_4(%arg0: i32) -> (i32, i32) {
    %c0_i32 = arith.constant 0 : i32
    %c0_i32_0 = arith.constant 0 : i32
    %c0_i32_1 = arith.constant 0 : i32
    return %c0_i32, %c0_i32_0 : i32, i32
  }
  func.func @transform_5(%arg0: i32) -> (i32, i32) {
    %c0_i32 = arith.constant 0 : i32
    %c0_i32_0 = arith.constant 0 : i32
    return %c0_i32, %arg0 : i32, i32
  }
}

</mosaic_0001>

<bundles_post_ra>
// kernel: weibull_forward.1
= control target key start
LH: loop header
LB: loop body
LE: loop exit
PB: predicated region body
PF: predicated region fallthrough
CT: control target
= control target key end

     0   :  { %s865_s0 = inlined_call_operand.vmem [shape: f32[300,32], index: 0, kind: input, shape index: {}]   ;;  %s866_s1 = inlined_call_operand.vmem [shape: f32[20,32], index: 1, kind: input, shape index: {}]   ;;  %s867_s2 = inlined_call_operand.vmem [shape: f32[20,1], index: 2, kind: input, shape index: {}]   ;;  %s868_s3 = inlined_call_operand.vmem [shape: f32[20,1], index: 3, kind: input, shape index: {}]   ;;  %s869_s4 = inlined_call_operand.<no memory space> [shape: f32[1,1], index: 4, kind: input, shape index: {}]   ;;  %s870_s5 = inlined_call_operand.hbm [shape: f32[1,300], index: 5, kind: output, shape index: {}]  }
   0x1   :  { %v10_v0 = vstv %s869_s4 }
   0x2   :  { %11 = vst [vmem:[#allocation2] sm:$0x1] %v10_v0 }
   0x3   :  { %12 = vsyncpa [#allocation4], 0 }
   0x4   :  { %14 = vsyncpa [#allocation4 + $0x1], 0  ;;  %s685_s20 = smov 0   ;;  %s687_s21 = smov 0  }
   0x5   :  { %s689_s22 = smov 0   ;;  %s691_s23 = smov 0  }
   0x6 LB: > { %s706_s4 = sadd.s32 4294967295, %s649_s23   ;;  %s483_s24 = sadd.s32 4294967294, %s649_s23   ;;  %s649_s23 = sphi %s691_s23, %s876_s23   ;;  %s645_s22 = sphi %s689_s22, %s875_s22   ;;  %s641_s21 = sphi %s687_s21, %s874_s21   ;;  %s637_s20 = sphi %s685_s20, %s873_s20  }
   0x7   : > { %s710_s25 = sadd.s32 1, %s649_s23   ;;  %s137_s26 = sadd.s32 1, %s645_s22 }
   0x8   : > { %s134_s27 = ssub.s32 %s649_s23, %s710_s25  ;;  %p147_p0 = scmp.ne.s32.totalorder %s645_s22, %s641_s21 }
   0x9   : > { %p135_p1 = scmp.eq.s32.totalorder %s134_s27, 0  ;;  %p148_p2 = scmp.eq.s32.totalorder %s706_s4, 2 }
   0xa   : > { %p153_p3 = scmp.ne.s32.totalorder %s641_s21, %s637_s20  ;;  %p154_p4 = scmp.eq.s32.totalorder %s483_s24, 2 }
   0xb   : > { %s721_s28 = scalar_select %p135_p1, %s645_s22, %s137_s26  }
   0xc   : > { %p723_p5 = por %p148_p2, %p147_p0  ;;  %p727_p6 = por %p154_p4, %p153_p3 }
   0xd   : > { %p486_p7 = scmp.ge.s32.totalorder %s649_s23, 1  ;;  %p201_p8 = scmp.lt.s32.totalorder %s649_s23, 4 }
   0xf   : > { %p202_p9 = pnand %p486_p7, %p201_p8 }
  0x10   : > { %s487_s6 = sshll.u32 (!%p202_p9), %s706_s4, 4  ;;  %s424_s15 = scalar_lea.hbm (!%p202_p9), %s870_s5, %s706_s4 }
  0x11   : > { %205 = sbr.rel (%p202_p9) target bundleno = 259 (0x103), region = 40  ;;  %p237_p10 = scmp.lt.s32.totalorder (!%p202_p9), %s487_s6, 37 }
  0x12   : > { %s428_s18 = sshll.u32 (!%p202_p9), %s424_s15, 4  ;;  %s607_s4 = scalar_lea.hbm (!%p202_p9), %s870_s5, 3  ;;  %s429_s18 = int_to_ptr.hbm [resolvable:$true] %s428_s18 }
  0x13   : > { %s601_s24 = sshra.s32 (!%p202_p9), %s429_s18, 4  ;;  %s602_s24 = int_to_ptr.hbm [resolvable:$true] %s601_s24 }
  0x14   : > { %s603_s26 = scalar_lea.hbm (!%p202_p9), %s602_s24, 1  ;;  %p608_p0 = scmp.lt.s32.totalorder (!%p202_p9), %s602_s24, %s870_s5 }
  0x15   : > { %p604_p11 = scmp.ne.s32.totalorder (!%p202_p9), %s602_s24, %s603_s26  ;;  %p609_p1 = scmp.lt.s32.totalorder (!%p202_p9), %s607_s4, %s603_s26 }
  0x16   : > { %s878_s6 = smov (!%p237_p10, %s487_s6), 37  ;;  %vm283_vm0 = vcmask 261120   ;;  %v265_v8 = vld [vmem:[%s867_s2] sm:$0xff]  ;;  %v651_v9 = vmov 0   ;;  %v266_v12 = vld [vmem:[%s867_s2 + $0x8] sm:$0xff]  ;;  %vm395_vm1 = vcmask 1043456  }
  0x17   : > { %s488_s7 = sshll.u32 %s878_s6, 3  ;;  %582 = vset.pattern.permute.xlu0 %v651_v9  ;;  %583 = vset.pattern.permute.xlu1 %v651_v9  ;;  %v267_v13 = vld [vmem:[%s867_s2 + $0x10] sm:$0xf]  ;;  %v374_v15 = vld [vmem:[%s868_s3 + $0x8] sm:$0xff]  ;;  %v404_v16 = vld [vmem:[#allocation2] sm:$0x1]  ;;  %p605_p12 = pnand %p604_p11, %p723_p5 }
  0x18   : > { %s737_s10 = scalar_lea.vmem %s865_s0, %s488_s7  ;;  %270 = vperm.xlu0 %582, %v265_v8   ;;  %584 = vset.pattern.permute.xlu2 %v651_v9  ;;  %v373_v18 = vld [vmem:[%s868_s3] sm:$0xff]  ;;  %v375_v19 = vld [vmem:[%s868_s3 + $0x10] sm:$0xf]  ;;  %v247_v26 = vld [vmem:[%s866_s1 + $0x8] sm:$0xff]  ;;  %p610_p2 = por %p609_p1, %p608_p0 }
  0x19   : > { %v264_v1 = vld [vmem:[%s737_s10 + $0x78] sm:$0xff]  ;;  %v263_v2 = vld [vmem:[%s737_s10 + $0x70] sm:$0xff]  ;;  %v262_v3 = vld [vmem:[%s737_s10 + $0x68] sm:$0xff]  ;;  %280 = vperm.xlu1 %583, %v267_v13   ;;  %383 = vperm.xlu2 %584, %v374_v15   ;;  %p606_p13 = pneg %p605_p12 }
  0x1a   : > { %489 = vmatpush.xpose.msk.msra.mxu0 %vm283_vm0, %v264_v1  ;;  %510 = vmatpush.xpose.msk.msra.mxu1 %vm283_vm0, %v264_v1  ;;  %v261_v4 = vld [vmem:[%s737_s10 + $0x60] sm:$0xff]  ;;  %v260_v5 = vld [vmem:[%s737_s10 + $0x58] sm:$0xff]  ;;  %v259_v6 = vld [vmem:[%s737_s10 + $0x50] sm:$0xff] }
  0x1b   : > { %511 = vmatpush.xpose.msk.msra.mxu2 %vm283_vm0, %v264_v1  ;;  %v258_v7 = vld [vmem:[%s737_s10 + $0x48] sm:$0xff]  ;;  %v257_v10 = vld [vmem:[%s737_s10 + $0x40] sm:$0xff]  ;;  %v256_v11 = vld [vmem:[%s737_s10 + $0x38] sm:$0xff]  ;;  %p611_p3 = pnand %p610_p2, %p606_p13 }
  0x1c   : > { %v255_v14 = vld [vmem:[%s737_s10 + $0x30] sm:$0xff]  ;;  %v254_v17 = vld [vmem:[%s737_s10 + $0x28] sm:$0xff]  ;;  %v253_v20 = vld [vmem:[%s737_s10 + $0x20] sm:$0xff] }
  0x1d   : > { %v252_v21 = vld [vmem:[%s737_s10 + $0x18] sm:$0xff]  ;;  %v251_v22 = vld [vmem:[%s737_s10 + $0x10] sm:$0xff]  ;;  %v250_v23 = vld [vmem:[%s737_s10 + $0x8] sm:$0xff] }
  0x1e   : > { %490 = vmatpush.xpose.msk.msra.mxu0 %vm283_vm0, %v263_v2  ;;  %512 = vmatpush.xpose.msk.msra.mxu1 %vm283_vm0, %v263_v2  ;;  %v249_v24 = vld [vmem:[%s737_s10] sm:$0xff]  ;;  %v248_v27 = vld [vmem:[%s866_s1 + $0x10] sm:$0xf]  ;;  %s230_s10 = sand.u32 1, %s641_s21  }
  0x1f   : > { %513 = vmatpush.xpose.msk.msra.mxu2 %vm283_vm0, %v263_v2  ;;  %v246_v25 = vld [vmem:[%s866_s1] sm:$0xff]  ;;  %s231_s16 = scalar_lea.vmem [#allocation3], %s230_s10  ;;  %s416_s19 = scalar_lea.sflag [#allocation4], %s230_s10 }
  0x20   : > { %275 = vperm.xlu0 %582, %v266_v12   ;;  %s426_s17 = sshll.u32 %s231_s16, 4  ;;  %s427_s17 = int_to_ptr.vmem [resolvable:$true] %s426_s17 }
  0x21   : > { %378 = vperm.xlu1 %583, %v373_v18   ;;  %388 = vperm.xlu2 %584, %v375_v19  }
  0x22   : > { %491 = vmatpush.xpose.msk.msra.mxu0 %vm283_vm0, %v262_v3  ;;  %514 = vmatpush.xpose.msk.msra.mxu1 %vm283_vm0, %v262_v3 }
  0x23   : > { %515 = vmatpush.xpose.msk.msra.mxu2 %vm283_vm0, %v262_v3 }
  0x26   : > { %492 = vmatpush.xpose.msk.msra.mxu0 %vm283_vm0, %v261_v4  ;;  %516 = vmatpush.xpose.msk.msra.mxu1 %vm283_vm0, %v261_v4 }
  0x27   : > { %517 = vmatpush.xpose.msk.msra.mxu2 %vm283_vm0, %v261_v4 }
  0x28   : > { %407 = vperm.xlu0 %582, %v404_v16  }
  0x2a   : > { %493 = vmatpush.xpose.msk.msra.mxu0 %vm283_vm0, %v260_v5  ;;  %518 = vmatpush.xpose.msk.msra.mxu1 %vm283_vm0, %v260_v5 }
  0x2b   : > { %519 = vmatpush.xpose.msk.msra.mxu2 %vm283_vm0, %v260_v5 }
  0x2e   : > { %494 = vmatpush.xpose.msk.msra.mxu0 %vm283_vm0, %v259_v6  ;;  %520 = vmatpush.xpose.msk.msra.mxu1 %vm283_vm0, %v259_v6 }
  0x2f   : > { %521 = vmatpush.xpose.msk.msra.mxu2 %vm283_vm0, %v259_v6 }
  0x32   : > { %495 = vmatpush.xpose.msk.msra.mxu0 %vm283_vm0, %v258_v7  ;;  %522 = vmatpush.xpose.msk.msra.mxu1 %vm283_vm0, %v258_v7 }
  0x33   : > { %523 = vmatpush.xpose.msk.msra.mxu2 %vm283_vm0, %v258_v7 }
  0x36   : > { %496 = vmatpush.xpose.msk.msra.mxu0 %vm283_vm0, %v257_v10  ;;  %524 = vmatpush.xpose.msk.msra.mxu1 %vm283_vm0, %v257_v10 }
  0x37   : > { %525 = vmatpush.xpose.msk.msra.mxu2 %vm283_vm0, %v257_v10 }
  0x3a   : > { %497 = vmatpush.xpose.msk.msra.mxu0 %vm283_vm0, %v256_v11  ;;  %526 = vmatpush.xpose.msk.msra.mxu1 %vm283_vm0, %v256_v11 }
  0x3b   : > { %527 = vmatpush.xpose.msk.msra.mxu2 %vm283_vm0, %v256_v11 }
  0x3e   : > { %498 = vmatpush.xpose.msk.msra.mxu0 %vm283_vm0, %v255_v14  ;;  %528 = vmatpush.xpose.msk.msra.mxu1 %vm283_vm0, %v255_v14 }
  0x3f   : > { %529 = vmatpush.xpose.msk.msra.mxu2 %vm283_vm0, %v255_v14 }
  0x42   : > { %499 = vmatpush.xpose.msk.msra.mxu0 %vm283_vm0, %v254_v17  ;;  %530 = vmatpush.xpose.msk.msra.mxu1 %vm283_vm0, %v254_v17 }
  0x43   : > { %531 = vmatpush.xpose.msk.msra.mxu2 %vm283_vm0, %v254_v17 }
  0x46   : > { %500 = vmatpush.xpose.msk.msra.mxu0 %vm283_vm0, %v253_v20  ;;  %532 = vmatpush.xpose.msk.msra.mxu1 %vm283_vm0, %v253_v20 }
  0x47   : > { %533 = vmatpush.xpose.msk.msra.mxu2 %vm283_vm0, %v253_v20 }
  0x4a   : > { %501 = vmatpush.xpose.msk.msra.mxu0 %vm283_vm0, %v252_v21  ;;  %534 = vmatpush.xpose.msk.msra.mxu1 %vm283_vm0, %v252_v21 }
  0x4b   : > { %535 = vmatpush.xpose.msk.msra.mxu2 %vm283_vm0, %v252_v21 }
  0x4e   : > { %502 = vmatpush.xpose.msk.msra.mxu0 %vm283_vm0, %v251_v22  ;;  %536 = vmatpush.xpose.msk.msra.mxu1 %vm283_vm0, %v251_v22 }
  0x4f   : > { %537 = vmatpush.xpose.msk.msra.mxu2 %vm283_vm0, %v251_v22 }
  0x52   : > { %503 = vmatpush.xpose.msk.msra.mxu0 %vm283_vm0, %v250_v23  ;;  %538 = vmatpush.xpose.msk.msra.mxu1 %vm283_vm0, %v250_v23 }
  0x53   : > { %539 = vmatpush.xpose.msk.msra.mxu2 %vm283_vm0, %v250_v23 }
  0x56   : > { %504 = vmatpush.xpose.msk.msra.mxu0 %vm283_vm0, %v249_v24  ;;  %540 = vmatpush.xpose.msk.msra.mxu1 %vm283_vm0, %v249_v24 }
  0x57   : > { %541 = vmatpush.xpose.msk.msra.mxu2 %vm283_vm0, %v249_v24 }
  0x59   : > { %505 = vmatmul.msk.f32.vlgmr.msra.gmra.mxu0 %vm283_vm0, %v246_v25  ;;  %506 = vmatmul.msk.f32.vlgmr.msra.gmra.mxu1 %vm283_vm0, %v247_v26 }
  0x5a   : > { %507 = vmatmul.msk.f32.vlgmr.msra.gmra.mxu2 %vm283_vm0, %v248_v27 }
  0x73   : > { %v384_v35 = vpop.permute.xlu2 %383 }
  0x7b   : > { %v389_v47 = vpop.permute.xlu2 %388 }
  0x8a   : > { %v271_v28 = vpop.permute.xlu0 %270 }
  0x8b   : > { %v281_v30 = vpop.permute.xlu1 %280 }
  0x92   : > { %v276_v29 = vpop.permute.xlu0 %275 }
  0x93   : > { %v379_v42 = vpop.permute.xlu1 %378 }
  0x9a   : > { %v408_v56 = vpop.permute.xlu0 %407 }
  0x9b   : > { %v410_v58 = vperm.slane %v408_v56, 0 }
  0xd6   : > { %v358_v31 = vpop.f32.mrf.mxu0  ;;  %v361_v32 = vpop.f32.mrf.mxu1 }
  0xd7   : > { %v359_v33 = vadd.f32 %v358_v31, %v271_v28  ;;  %v362_v34 = vadd.f32 %v361_v32, %v276_v29 }
  0xd9   : > { %v367_v36 = vmul.f32 0.01, %v359_v33  ;;  %v368_v37 = vmul.f32 0.01, %v362_v34 }
  0xdb   : > { %v371_v38 = vmax.f32 %v362_v34, %v368_v37  ;;  %v370_v39 = vmax.f32 %v359_v33, %v367_v36 }
  0xdd   : > { %v364_v40 = vpop.f32.mrf.mxu2  ;;  %v391_v44 = vmul.f32 %v379_v42, %v370_v39  ;;  %v392_v45 = vmul.f32 %v384_v35, %v371_v38 }
  0xde   : > { %v365_v41 = vadd.f32 %v364_v40, %v281_v30 }
  0xdf   : > { %v394_v49 = vadd.f32 %v392_v45, %v391_v44 }
  0xe0   : > { %v369_v43 = vmul.f32 0.01, %v365_v41 }
  0xe2   : > { %v372_v46 = vmax.f32 %v365_v41, %v369_v43 }
  0xe4   : > { %v393_v48 = vmul.f32 %v389_v47, %v372_v46 }
  0xe6   : > { %v396_v50 = vsel %vm395_vm1, %v393_v48, 0.0 }
  0xe7   : > { %v397_v51 = vadd.f32 %v396_v50, %v394_v49 }
  0xe9   : > { %v398_v52 = vrot.slane %v397_v51, 4 }
  0xeb   : > { %v399_v53 = vadd.f32 %v398_v52, %v397_v51 }
  0xed   : > { %v400_v54 = vrot.slane %v399_v53, 2 }
  0xef   : > { %v401_v55 = vadd.f32 %v400_v54, %v399_v53 }
  0xf1   : > { %v402_v57 = vrot.slane %v401_v55, 1 }
  0xf3   : > { %v403_v59 = vadd.f32 %v402_v57, %v401_v55 }
  0xf5   : > { %v411_v60 = vadd.f32 %v410_v58, %v403_v59 }
  0xf7   : > { %v412_v61 = vmul.f32 1.442695, %v411_v60 }
  0xf9   : > { %585 = vpow2.f32 %v412_v61 }
  0xff   : > { %v586_v62 = vpop.eup %585 }
 0x100   : > { %414 = vst [vmem:[%s231_s16] sm:$0x1] %v586_v62 }
 0x101   : > { %614 = shalt.err (!%p611_p3)
}
 0x102   : > { %542 = dma.vmem_to_hbm [thread:$0]  (%p723_p5), %s427_s17, 16, %s429_s18, %s416_s19  }
 0x103 PF: > { %p548_p4 = scmp.ge.s32.totalorder %s649_s23, 2  ;;  %s440_s9 = sand.u32 1, %s637_s20  }
 0x104   : > { %s441_s11 = scalar_lea.sflag [#allocation4], %s440_s9 }
 0x105   : > { %p545_p7 = pnand %p548_p4, %p727_p6 }
 0x107   : > { %p546_p8 = pneg %p545_p7 }
 0x109   : > { %632 = dma.done.wait (%p546_p8), %s441_s11, 16  }
 0x10a   : > { %634 = vsyncadd (%p546_p8), %s441_s11, 4294967280  ;;  %p17_p9 = scmp.ge.s32.totalorder %s710_s25, 5   ;;  %s873_s20 = smov %s641_s21 }
 0x10b   : > { %s874_s21 = smov %s645_s22  ;;  %s875_s22 = smov %s721_s28 }
 0x10c   : > { %s876_s23 = smov %s710_s25  ;;  %19 = sbr.rel (!%p17_p9) target bundleno = 6 (0x6), region = 75 }
 0x111   :  { %446 = vsyncpa [#allocation4], 1 }
 0x112   :  { %448 = vsyncpa [#allocation4 + $0x1], 1 }

</bundles_post_ra>
